<compile_context>
chip_gen: v5e
topology: v5e:2x2
jax: 0.10.0
libtpu: 0.0.40
codegen_flags: <defaults>
</compile_context>

<pallas_src>
import jax
import jax.numpy as jnp
from jax.experimental import pallas as pl
from jax.experimental.pallas import tpu as pltpu


BN_EPS = 1e-5
TM_MAX = 256      # M-tile rows per grid step once M is large enough to tile
TK_MAX = 1024     # max contraction tile
TN_MAX = 512      # max output-channel tile


def _cdiv(a, b):
    return -(-a // b)


def _round_up(v, m):
    return _cdiv(v, m) * m


def _split_dim(size, tile_max, align):
    """Pad `size` and pick a tile with tile <= tile_max and tile % align == 0,
    minimizing zero padding."""
    size = _round_up(max(size, 1), align)
    n = _cdiv(size, tile_max)
    tile = _round_up(_cdiv(size, n), align)
    return _round_up(size, tile), tile


def _m_tiles(m):
    # 32-row alignment keeps bf16 (16) and f32 (8) sublane packing dense.
    mp = _round_up(max(m, 1), 32)
    if mp <= 2 * TM_MAX:
        return mp, mp                       # single resident tile, tiny problem
    return _split_dim(mp, TM_MAX, 32)


_VMEM_LIMIT = None


def _vmem_limit():
    """Generation-aware VMEM budget (v7x only has 64 MiB of physical VMEM)."""
    global _VMEM_LIMIT
    if _VMEM_LIMIT is None:
        cap = 128 * 1024 * 1024
        try:
            cap = int(pltpu.get_tpu_info().vmem_capacity_bytes)
        except Exception:
            pass
        _VMEM_LIMIT = min(48 * 1024 * 1024, (2 * cap) // 3)
    return _VMEM_LIMIT


# --------------------------- Pallas kernels ---------------------------

def _make_matmul_stats_kernel(m_rows, tm, n_k):
    """MXU matmul whose epilogue emits per-M-tile BN partial statistics.

    Per (M tile, C tile) the stats output holds:
      row 0: per-channel sum of the valid rows (zero-padded rows contribute 0)
      row 1: per-channel sum of (y - tile_mean)^2 over the VALID rows only
             (padded rows are excluded via a row mask).
    The plain-JAX combine (Chan's parallel variance) then gives exact,
    cancellation-free training-mode batch statistics.
    """

    def _epilogue(acc, y_ref, st_ref):
        y_ref[...] = acc
        mi = pl.program_id(0)
        n_rem = jnp.int32(m_rows) - mi * jnp.int32(tm)          # valid rows here
        n_valid = jnp.maximum(jnp.minimum(n_rem, jnp.int32(tm)), 1)
        row = jax.lax.broadcasted_iota(jnp.int32, acc.shape, 0)
        mask = (row < n_rem).astype(jnp.float32)
        s = jnp.sum(acc, axis=0, keepdims=True)                  # (1, tn)
        d = acc - s / n_valid.astype(jnp.float32)
        m2 = jnp.sum(mask * d * d, axis=0, keepdims=True)        # (1, tn)
        st_ref[...] = jnp.concatenate([s, m2], axis=0)[None]     # (1, 2, tn)

    if n_k == 1:
        # Specialized single-K-step path: no scratch accumulator, no RMW.
        def kernel(x_ref, w_ref, y_ref, st_ref):
            acc = jnp.dot(x_ref[...], w_ref[...],
                          preferred_element_type=jnp.float32)
            _epilogue(acc, y_ref, st_ref)
    else:
        def kernel(x_ref, w_ref, y_ref, st_ref, acc_ref):
            @pl.when(pl.program_id(2) == 0)
            def _():
                acc_ref[...] = jnp.zeros_like(acc_ref)

            acc_ref[...] += jnp.dot(x_ref[...], w_ref[...],
                                    preferred_element_type=jnp.float32)

            @pl.when(pl.program_id(2) == n_k - 1)
            def _():
                _epilogue(acc_ref[...], y_ref, st_ref)

    return kernel


def _make_bn_apply_kernel(has_residual):
    """Per-tile: y*scale + shift (+ residual) then per-channel-masked ReLU."""

    def _apply(y, scale, shift, relu_mask, res):
        out = y * scale + shift
        if res is not None:
            out = out + res.astype(jnp.float32)
        return jnp.where(relu_mask != 0.0, jnp.maximum(out, 0.0), out)

    if has_residual:
        def kernel(y_ref, sc_ref, sh_ref, mk_ref, r_ref, o_ref):
            o_ref[...] = _apply(y_ref[...], sc_ref[...], sh_ref[...],
                                mk_ref[...], r_ref[...]).astype(o_ref.dtype)
    else:
        def kernel(y_ref, sc_ref, sh_ref, mk_ref, o_ref):
            o_ref[...] = _apply(y_ref[...], sc_ref[...], sh_ref[...],
                                mk_ref[...], None).astype(o_ref.dtype)
    return kernel


# --------------------------- layer wrapper ---------------------------

def _conv_bn_layer(x_cl, layer, *, residual=None, out_dtype=jnp.bfloat16):
    """Conv1d (possibly two convs fused along C_out) + training-mode BN
    (+ optional residual add) + per-channel-masked ReLU.

    x_cl:     (N, L_in, C_in) bf16, channels-last.
    residual: optional (N*L_out, C_res) bf16, added after BN, before ReLU.
    Returns   ((N*L_out, Cp) array in out_dtype, L_out).
    """
    N, L_in, C_in = x_cl.shape
    K, s, p = layer["ksp"]
    kp, tk, cp, tn = layer["kc"]
    k_eff = K * C_in
    L_out = (L_in + 2 * p - K) // s + 1
    M = N * L_out
    mp, tm = _m_tiles(M)
    mt, ct, kt = mp // tm, cp // tn, kp // tk

    # im2col as K strided tap-slices (bf16, channels-last, no gather/where).
    x_pad = jnp.pad(x_cl, ((0, 0), (p, p), (0, 0))) if p else x_cl
    taps = [jax.lax.slice_in_dim(x_pad, k, k + s * (L_out - 1) + 1, stride=s,
                                 axis=1) for k in range(K)]
    cols = jnp.stack(taps, axis=2).reshape(M, k_eff)      # (k, c_in) col order
    cols = jnp.pad(cols, ((0, mp - M), (0, kp - k_eff)))

    # ---- pass 1: tiled MXU matmul + per-tile BN partial statistics ----
    kern_a = _make_matmul_stats_kernel(M, tm, kt)
    y_pre, stats = pl.pallas_call(
        kern_a,
        out_shape=(jax.ShapeDtypeStruct((mp, cp), jnp.float32),
                   jax.ShapeDtypeStruct((mt, 2, cp), jnp.float32)),
        grid_spec=pltpu.PrefetchScalarGridSpec(
            num_scalar_prefetch=0,
            grid=(mt, ct, kt),
            in_specs=[pl.BlockSpec((tm, tk), lambda mi, j, kk: (mi, kk)),
                      pl.BlockSpec((tk, tn), lambda mi, j, kk: (kk, j))],
            out_specs=[pl.BlockSpec((tm, tn), lambda mi, j, kk: (mi, j)),
                       pl.BlockSpec((1, 2, tn), lambda mi, j, kk: (mi, 0, j))],
            scratch_shapes=([pltpu.VMEM((tm, tn), jnp.float32)]
                            if kt > 1 else []),
        ),
        compiler_params=pltpu.CompilerParams(
            dimension_semantics=("parallel", "parallel", "arbitrary"),
            vmem_limit_bytes=_vmem_limit()),
        cost_estimate=pl.CostEstimate(
            flops=2 * mp * kp * cp, transcendentals=0,
            bytes_accessed=mp * kp * 2 + kp * cp * 2 + mp * cp * 4),
    )(cols, layer["w"])

    # ---- combine per-tile stats (tiny, f32, Chan's parallel variance) ----
    counts = jnp.full((mt,), float(tm), jnp.float32)
    counts = counts.at[mt - 1].set(float(M - (mt - 1) * tm))
    s_i, m2_i = stats[:, 0, :], stats[:, 1, :]
    mean_i = s_i / counts[:, None]
    mean = jnp.sum(s_i, axis=0) / float(M)
    m2 = jnp.sum(m2_i, axis=0) + jnp.sum(
        counts[:, None] * (mean_i - mean[None, :]) ** 2, axis=0)
    var = jnp.maximum(m2 / float(M), 0.0)
    inv = jax.lax.rsqrt(var + BN_EPS)
    scale = (layer["gamma"] * inv).reshape(1, cp)
    shift = (layer["beta"] - mean * layer["gamma"] * inv).reshape(1, cp)

    # ---- pass 2: normalize (+ residual) (+ masked ReLU), per (tm, tn) tile ----
    inputs = [y_pre, scale, shift, layer["relu"]]
    in_specs = [pl.BlockSpec((tm, tn), lambda mi, j: (mi, j)),
                pl.BlockSpec((1, tn), lambda mi, j: (0, j)),
                pl.BlockSpec((1, tn), lambda mi, j: (0, j)),
                pl.BlockSpec((1, tn), lambda mi, j: (0, j))]
    if residual is not None:
        r = jnp.pad(residual.astype(jnp.bfloat16),
                    ((0, mp - residual.shape[0]), (0, cp - residual.shape[1])))
        inputs.append(r)
        in_specs.append(pl.BlockSpec((tm, tn), lambda mi, j: (mi, j)))

    kern_b = _make_bn_apply_kernel(residual is not None)
    out_bytes = jnp.dtype(out_dtype).itemsize
    out = pl.pallas_call(
        kern_b,
        out_shape=jax.ShapeDtypeStruct((mp, cp), out_dtype),
        grid_spec=pltpu.PrefetchScalarGridSpec(
            num_scalar_prefetch=0,
            grid=(mt, ct),
            in_specs=in_specs,
            out_specs=pl.BlockSpec((tm, tn), lambda mi, j: (mi, j)),
        ),
        compiler_params=pltpu.CompilerParams(
            dimension_semantics=("parallel", "parallel"),
            vmem_limit_bytes=_vmem_limit()),
        cost_estimate=pl.CostEstimate(
            flops=4 * mp * cp, transcendentals=0,
            bytes_accessed=mp * cp * (4 + out_bytes
                                      + (2 if residual is not None else 0))),
    )(*inputs)

    return out[:M], L_out


# --------------------------- params / forward ---------------------------

def _uniform_conv_weight(key, c_out, c_in, k):
    bound = 1.0 / float(c_in * k) ** 0.5        # PyTorch Conv1d default init
    return jax.random.uniform(key, (c_out, c_in, k), jnp.float32, -bound, bound)


def _pack_layer(raw_weights, relu_flags, ksp):
    """Pack >=1 convs sharing (C_in, K, stride, pad) into ONE matmul layout:
    weights reshaped to (K*C_in, sum C_out), padded to MXU-aligned (kp, cp)
    and cast to bf16 once.  gamma/beta are fresh BN params; `relu` is a
    per-channel mask (1.0 = apply ReLU in kernel B)."""
    c_in, k = raw_weights[0].shape[1], raw_weights[0].shape[2]
    k_eff = c_in * k
    c_tot = sum(int(w.shape[0]) for w in raw_weights)
    kp, tk = _split_dim(k_eff, TK_MAX, 128)
    cp, tn = _split_dim(c_tot, TN_MAX, 128)
    mats = [jnp.transpose(w, (2, 1, 0)).reshape(k_eff, w.shape[0])
            for w in raw_weights]
    w_mat = jnp.concatenate(mats, axis=1)
    w_mat = jnp.pad(w_mat, ((0, kp - k_eff), (0, cp - c_tot))).astype(jnp.bfloat16)
    gamma = jnp.pad(jnp.ones((c_tot,), jnp.float32), (0, cp - c_tot))
    beta = jnp.zeros((cp,), jnp.float32)
    relu = jnp.concatenate(
        [jnp.full((int(w.shape[0]),), 1.0 if f else 0.0, jnp.float32)
         for w, f in zip(raw_weights, relu_flags)])
    relu = jnp.pad(relu, (0, cp - c_tot)).reshape(1, cp)
    return dict(w=w_mat, gamma=gamma, beta=beta, relu=relu,
                ksp=ksp, kc=(kp, tk, cp, tn), c_tot=c_tot)


def init_basic_block(key, in_channels, out_channels, kernel_size, stride,
                     padding):
    k1, k2, k3 = jax.random.split(key, 3)
    conv_shortcut = (in_channels != out_channels
                     or (kernel_size, stride, padding) != (3, 1, 1))
    w1 = _uniform_conv_weight(k1, out_channels, in_channels, kernel_size)
    w2 = _uniform_conv_weight(k2, out_channels, out_channels, 3)
    w_sc = (_uniform_conv_weight(k3, out_channels, in_channels, kernel_size)
            if conv_shortcut else None)
    ksp1 = (kernel_size, stride, padding)
    if conv_shortcut:
        # shortcut conv shares (K, stride, pad, C_in) with conv1 -> ONE matmul
        layer1 = _pack_layer([w1, w_sc], [True, False], ksp1)
    else:
        layer1 = _pack_layer([w1], [True], ksp1)
    layer2 = _pack_layer([w2], [True], (3, 1, 1))
    return {
        "layer1": layer1, "layer2": layer2,
        "fused_shortcut": conv_shortcut, "c_out": out_channels,
        "_raw": dict(w1=w1, w2=w2, w_sc=w_sc, ksp1=ksp1),   # for the reference
    }


def basic_block_forward(params, x):
    """x: (N, C_in, L) float32 (PyTorch NCL) -> (N, C_out, L_out) float32."""
    N = x.shape[0]
    c_out = params["c_out"]
    x_cl = jnp.transpose(x, (0, 2, 1)).astype(jnp.bfloat16)   # (N, L, C_in)

    out1, L1 = _conv_bn_layer(x_cl, params["layer1"], out_dtype=jnp.bfloat16)
    h1 = out1[:, :c_out].reshape(N, L1, c_out)                # conv1+BN+ReLU
    if params["fused_shortcut"]:
        sc = out1[:, c_out:2 * c_out]                         # shortcut conv+BN
    else:
        sc = x_cl.reshape(-1, x_cl.shape[-1])                 # identity shortcut

    out2, L2 = _conv_bn_layer(h1, params["layer2"], residual=sc,
                              out_dtype=jnp.float32)          # conv2+BN+add+ReLU
    y = out2[:, :c_out].reshape(N, L2, c_out)
    return jnp.transpose(y, (0, 2, 1))                        # back to NCL


# --------------------------- pure-JAX reference ---------------------------

def _ref_conv_bn(x_cl, w, ksp, relu):
    K, s, p = ksp
    N, L, C_in = x_cl.shape
    x_pad = jnp.pad(x_cl, ((0, 0), (p, p), (0, 0))) if p else x_cl
    L_out = (L + 2 * p - K) // s + 1
    taps = [jax.lax.slice_in_dim(x_pad, k, k + s * (L_out - 1) + 1, stride=s,
                                 axis=1) for k in range(K)]
    g = jnp.stack(taps, axis=2).reshape(N * L_out, K * C_in)
    wm = jnp.transpose(w, (2, 1, 0)).reshape(K * C_in, -1)
    y = g @ wm
    mean = y.mean(axis=0)
    var = jnp.mean((y - mean) ** 2, axis=0)
    y = (y - mean) * jax.lax.rsqrt(var + BN_EPS)
    if relu:
        y = jnp.maximum(y, 0.0)
    return y.reshape(N, L_out, -1)


def _reference_forward(params, x):
    raw = params["_raw"]
    x_cl = jnp.transpose(x, (0, 2, 1)).astype(jnp.float32)
    h = _ref_conv_bn(x_cl, raw["w1"], raw["ksp1"], relu=True)
    if raw["w_sc"] is not None:
        sc = _ref_conv_bn(x_cl, raw["w_sc"], raw["ksp1"], relu=False)
    else:
        sc = x_cl
    out = _ref_conv_bn(h, raw["w2"], (3, 1, 1), relu=False) + sc
    out = jnp.maximum(out, 0.0)
    return jnp.transpose(out, (0, 2, 1))


if __name__ == "__main__":
    key = jax.random.PRNGKey(0)
    k1, k2, kx = jax.random.split(key, 3)

    # Block with a conv shortcut: in=32, out=64, kernel=3, stride=2, pad=1.
    params1 = init_basic_block(k1, 32, 64, 3, 2, 1)
    x = jax.random.normal(kx, (2, 32, 16), dtype=jnp.float32)
    y1 = jax.block_until_ready(basic_block_forward(params1, x))
    assert y1.shape == (2, 64, 8), y1.shape
    err1 = float(jnp.max(jnp.abs(y1 - _reference_forward(params1, x))))
    assert err1 < 0.2, err1

    # Block with the identity shortcut: in=out=64, kernel=3, stride=1, pad=1.
    params2 = init_basic_block(k2, 64, 64, 3, 1, 1)
    y2 = jax.block_until_ready(basic_block_forward(params2, y1))
    assert y2.shape == (2, 64, 8), y2.shape
    err2 = float(jnp.max(jnp.abs(y2 - _reference_forward(params2, y1))))
    assert err2 < 0.2, err2

    assert bool(jnp.all(jnp.isfinite(y2)))
    print("KERNEL_OK")
</pallas_src>

<mosaic_0001>
module attributes {stable_mosaic.version = 11 : i64} {
  func.func @kernel(%arg0: i32, %arg1: i32, %arg2: i32, %arg3: memref<32x128xbf16, #tpu.memory_space<vmem>>, %arg4: memref<128x128xbf16, #tpu.memory_space<vmem>>, %arg5: memref<32x128xf32, #tpu.memory_space<vmem>>, %arg6: memref<1x2x128xf32, #tpu.memory_space<vmem>>) attributes {dimension_semantics = [#tpu.dimension_semantics<parallel>, #tpu.dimension_semantics<parallel>, #tpu.dimension_semantics<arbitrary>], iteration_bounds = array<i64: 1, 1, 1>, scalar_prefetch = 0 : i64, scratch_operands = 0 : i64, tpu.core_type = #tpu.core_type<tc>, window_params = [{transform_indices = @transform_0, window_bounds = array<i64: 32, 128>}, {transform_indices = @transform_1, window_bounds = array<i64: 128, 128>}, {transform_indices = @transform_2, window_bounds = array<i64: 32, 128>}, {transform_indices = @transform_3, window_bounds = array<i64: 1, 2, 128>}]} {
    %c0 = arith.constant 0 : index
    %c0_0 = arith.constant 0 : index
    %0 = vector.load %arg3[%c0, %c0_0] : memref<32x128xbf16, #tpu.memory_space<vmem>>, vector<32x128xbf16>
    %c0_1 = arith.constant 0 : index
    %c0_2 = arith.constant 0 : index
    %1 = vector.load %arg4[%c0_1, %c0_2] : memref<128x128xbf16, #tpu.memory_space<vmem>>, vector<128x128xbf16>
    %cst = arith.constant dense<0.000000e+00> : vector<32x128xf32>
    %2 = tpu.matmul %0, %1, %cst {dimension_numbers = #tpu.dot_dimension_numbers<[1], [0], [0], [1], [0, 0, 1, 1], [], []>} : vector<32x128xbf16>, vector<128x128xbf16>, vector<32x128xf32> -> vector<32x128xf32>
    %c0_3 = arith.constant 0 : index
    %c0_4 = arith.constant 0 : index
    %3 = vector.load %arg5[%c0_3, %c0_4] : memref<32x128xf32, #tpu.memory_space<vmem>>, vector<32x128xf32>
    tpu.vector_store %arg5[%c0_3, %c0_4], %2 {strides = array<i32>} : memref<32x128xf32, #tpu.memory_space<vmem>>, vector<32x128xf32>,
    %c32_i32 = arith.constant 32 : i32
    %4 = arith.muli %arg0, %c32_i32 : i32
    %c16_i32 = arith.constant 16 : i32
    %5 = arith.subi %c16_i32, %4 : i32
    %c32_i32_5 = arith.constant 32 : i32
    %6 = arith.minsi %5, %c32_i32_5 : i32
    %c1_i32 = arith.constant 1 : i32
    %7 = arith.maxsi %6, %c1_i32 : i32
    %8 = tpu.iota {dimensions = array<i32: 0>} : vector<32x128xi32>
    %9 = vector.broadcast %5 : i32 to vector<32x128xi32>
    %10 = arith.cmpi slt, %8, %9 : vector<32x128xi32>
    %11 = arith.extui %10 : vector<32x128xi1> to vector<32x128xi32>
    %12 = arith.sitofp %11 : vector<32x128xi32> to vector<32x128xf32>
    %cst_6 = arith.constant dense<0.000000e+00> : vector<128xf32>
    %13 = vector.multi_reduction <add>, %2, %cst_6 [0] : vector<32x128xf32> to vector<128xf32>
    %14 = vector.shape_cast %13 : vector<128xf32> to vector<1x128xf32>
    %15 = arith.sitofp %7 : i32 to f32
    %16 = vector.broadcast %15 : f32 to vector<1x128xf32>
    %17 = arith.divf %14, %16 : vector<1x128xf32>
    %18 = vector.broadcast %17 : vector<1x128xf32> to vector<32x128xf32>
    %19 = arith.subf %2, %18 : vector<32x128xf32>
    %20 = arith.mulf %12, %19 : vector<32x128xf32>
    %21 = arith.mulf %20, %19 : vector<32x128xf32>
    %cst_7 = arith.constant dense<0.000000e+00> : vector<128xf32>
    %22 = vector.multi_reduction <add>, %21, %cst_7 [0] : vector<32x128xf32> to vector<128xf32>
    %23 = vector.shape_cast %22 : vector<128xf32> to vector<1x128xf32>
    %24 = tpu.concatenate %14, %23 in 0 : vector<1x128xf32>, vector<1x128xf32> -> vector<2x128xf32>
    %25 = vector.shape_cast %24 : vector<2x128xf32> to vector<1x2x128xf32>
    %c0_8 = arith.constant 0 : index
    %c0_9 = arith.constant 0 : index
    %c0_10 = arith.constant 0 : index
    %26 = vector.load %arg6[%c0_8, %c0_9, %c0_10] : memref<1x2x128xf32, #tpu.memory_space<vmem>>, vector<1x2x128xf32>
    tpu.vector_store %arg6[%c0_8, %c0_9, %c0_10], %25 {strides = array<i32>} : memref<1x2x128xf32, #tpu.memory_space<vmem>>, vector<1x2x128xf32>,
    return
  }
  func.func @transform_0(%arg0: i32, %arg1: i32, %arg2: i32) -> (i32, i32) {
    %c0_i32 = arith.constant 0 : i32
    return %arg0, %arg2 : i32, i32
  }
  func.func @transform_1(%arg0: i32, %arg1: i32, %arg2: i32) -> (i32, i32) {
    %c0_i32 = arith.constant 0 : i32
    return %arg2, %arg1 : i32, i32
  }
  func.func @transform_2(%arg0: i32, %arg1: i32, %arg2: i32) -> (i32, i32) {
    %c0_i32 = arith.constant 0 : i32
    return %arg0, %arg1 : i32, i32
  }
  func.func @transform_3(%arg0: i32, %arg1: i32, %arg2: i32) -> (i32, i32, i32) {
    %c0_i32 = arith.constant 0 : i32
    %c0_i32_0 = arith.constant 0 : i32
    return %arg0, %c0_i32, %arg1 : i32, i32, i32
  }
}

</mosaic_0001>

<bundles_post_ra>
// kernel: tpu_custom_call.1
= control target key start
LH: loop header
LB: loop body
LE: loop exit
PB: predicated region body
PF: predicated region fallthrough
CT: control target
= control target key end

     0   :  { %9 = vsyncpa [#allocation3], 0  ;;  %s474_s0 = inlined_call_operand.hbm [shape: bf16[32,128], index: 0, kind: input, shape index: {}]   ;;  %s475_s1 = inlined_call_operand.hbm [shape: bf16[128,128], index: 1, kind: input, shape index: {}]   ;;  %s476_s2 = inlined_call_operand.hbm [shape: f32[32,128], index: 2, kind: output, shape index: {0}]   ;;  %s477_s3 = inlined_call_operand.hbm [shape: f32[1,2,128], index: 3, kind: output, shape index: {1}]  }
   0x1   :  { %10 = vsyncpa [#allocation6], 0 }
   0x2   :  { %11 = vsyncpa [#allocation4], 0 }
   0x3   :  { %12 = vsyncpa [#allocation9], 0  ;;  %s17_s14 = sshll.u32 %s474_s0, 4  ;;  %s433_s15 = smov [#allocation2]   ;;  %s18_s14 = int_to_ptr.hbm [resolvable:$true] %s17_s14 }
   0x4   :  { %s19_s16 = sshll.u32 %s433_s15, 4  ;;  %s30_s19 = sshll.u32 %s475_s1, 4  ;;  %s20_s16 = int_to_ptr.vmem [resolvable:$true] %s19_s16  ;;  %s31_s19 = int_to_ptr.hbm [resolvable:$true] %s30_s19 }
   0x5   :  { %s434_s20 = smov 64   ;;  %s435_s21 = smov 4  }
   0x6   :  { %25 = dma.hbm_to_vmem [thread:$0]  %s18_s14, 256, %s20_s16, [#allocation3], %s434_s20, %s434_s20, %s435_s21  }
   0x7   :  { %s436_s22 = smov [#allocation5]  }
   0x8   :  { %s32_s23 = sshll.u32 %s436_s22, 4  ;;  %s33_s23 = int_to_ptr.vmem [resolvable:$true] %s32_s23 }
   0x9   :  { %38 = dma.hbm_to_vmem [thread:$0]  %s31_s19, 1024, %s33_s23, [#allocation6], %s434_s20, %s434_s20, %s435_s21  }
   0xa   :  { %425 = dma.done.wait [#allocation3], 256  }
   0xb   :  { %426 = vsyncadd [#allocation3], 4294967040 }
   0xc   :  { %427 = dma.done.wait [#allocation6], 1024  }
   0xd   :  { %428 = vsyncadd [#allocation6], 4294966272  ;;  %v309_v0 = vld [vmem:[#allocation5 + $0x38] sm:$0xff]  ;;  %v308_v1 = vld [vmem:[#allocation5 + $0x30] sm:$0xff]  ;;  %v437_v10 = vmov 16.0   ;;  %s438_s0 = smov [#allocation7]  }
   0xe   :  { %127 = vmatpush.bf16.msra.mxu0 %v309_v0  ;;  %310 = vmatpush.bf16.msra.mxu1 %v309_v0  ;;  %v307_v2 = vld [vmem:[#allocation5 + $0x28] sm:$0xff]  ;;  %v306_v3 = vld [vmem:[#allocation5 + $0x20] sm:$0xff]  ;;  %v305_v4 = vld [vmem:[#allocation5 + $0x18] sm:$0xff]  ;;  %327 = vrcp.f32 %v437_v10  ;;  %s228_s1 = sshll.u32 %s438_s0, 4  ;;  %s230_s26 = sshll.u32 %s476_s2, 4  ;;  %vm221_vm1 = vcmask 1040384   ;;  %s229_s1 = int_to_ptr.vmem [resolvable:$true] %s228_s1  ;;  %s231_s26 = int_to_ptr.hbm [resolvable:$true] %s230_s26 }
   0xf   :  { %v304_v5 = vld [vmem:[#allocation5 + $0x10] sm:$0xff]  ;;  %v303_v6 = vld [vmem:[#allocation5 + $0x8] sm:$0xff]  ;;  %v302_v7 = vld [vmem:[#allocation5] sm:$0xff]  ;;  %s439_s27 = smov 128   ;;  %s440_s28 = smov 8  }
  0x10   :  { %v300_v8 = vld [vmem:[#allocation2] sm:$0xff]  ;;  %v301_v9 = vld [vmem:[#allocation2 + $0x8] sm:$0xff]  ;;  %s441_s2 = smov [#allocation8]   ;;  %s244_s5 = sshll.u32 %s477_s3, 4  ;;  %s245_s5 = int_to_ptr.hbm [resolvable:$true] %s244_s5 }
  0x11   :  { %s242_s29 = sshll.u32 %s441_s2, 4  ;;  %s243_s29 = int_to_ptr.vmem [resolvable:$true] %s242_s29 }
  0x12   :  { %128 = vmatpush.bf16.msra.mxu0 %v308_v1  ;;  %311 = vmatpush.bf16.msra.mxu1 %v308_v1 }
  0x14   :  { %v328_v13 = vpop.eup %327 }
  0x15   :  { %v186_v16 = vmul.f32 16.0, %v328_v13  ;;  %vm191_vm0 = vweird.f32 %v328_v13 }
  0x16   :  { %129 = vmatpush.bf16.msra.mxu0 %v307_v2  ;;  %312 = vmatpush.bf16.msra.mxu1 %v307_v2 }
  0x17   :  { %v187_v19 = vsub.f32 1.0, %v186_v16 }
  0x19   :  { %v188_v22 = vmul.f32 %v328_v13, %v187_v19 }
  0x1a   :  { %130 = vmatpush.bf16.msra.mxu0 %v306_v3  ;;  %313 = vmatpush.bf16.msra.mxu1 %v306_v3 }
  0x1b   :  { %v189_v25 = vadd.f32 %v328_v13, %v188_v22 }
  0x1d   :  { %v193_v28 = vsel %vm191_vm0, %v328_v13, %v189_v25 }
  0x1e   :  { %131 = vmatpush.bf16.msra.mxu0 %v305_v4  ;;  %314 = vmatpush.bf16.msra.mxu1 %v305_v4 }
  0x22   :  { %132 = vmatpush.bf16.msra.mxu0 %v304_v5  ;;  %315 = vmatpush.bf16.msra.mxu1 %v304_v5 }
  0x26   :  { %133 = vmatpush.bf16.msra.mxu0 %v303_v6  ;;  %316 = vmatpush.bf16.msra.mxu1 %v303_v6 }
  0x2a   :  { %134 = vmatpush.bf16.msra.mxu0 %v302_v7  ;;  %317 = vmatpush.bf16.msra.mxu1 %v302_v7 }
  0x2d   :  { %135 = vmatmul.bf16.vlgmr.msra.gmra.mxu0 %v300_v8  ;;  %140 = vmatmul.bf16.vlgmr.msra.gmra.mxu1 %v301_v9 }
  0xaa   :  { %v136_v11 = vpop.f32.mrf.mxu0  ;;  %v141_v12 = vpop.f32.mrf.mxu1 }
  0xab   :  { %146 = vst [vmem:[#allocation7] sm:$0xff] %v136_v11 }
  0xac   :  { %148 = vst [vmem:[#allocation7 + $0x10] sm:$0xff] %v141_v12 }
  0xb2   :  { %v138_v14 = vpop.f32.mrf.mxu0  ;;  %v143_v15 = vpop.f32.mrf.mxu1 }
  0xb3   :  { %147 = vst [vmem:[#allocation7 + $0x8] sm:$0xff] %v138_v14  ;;  %v174_v17 = vadd.f32 %v138_v14, %v136_v11 }
  0xb4   :  { %149 = vst [vmem:[#allocation7 + $0x18] sm:$0xff] %v143_v15 }
  0xb5   :  { %v175_v18 = vadd.f32 %v174_v17, %v141_v12  ;;  %236 = dma.vmem_to_hbm [thread:$0]  %s229_s1, 512, %s231_s26, [#allocation4], %s439_s27, %s439_s27, %s440_s28  }
  0xb7   :  { %v176_v20 = vadd.f32 %v175_v18, %v143_v15 }
  0xb9   :  { %v177_v21 = vrot.slane %v176_v20, 4 }
  0xbb   :  { %v178_v23 = vadd.f32 %v177_v21, %v176_v20 }
  0xbd   :  { %v179_v24 = vrot.slane %v178_v23, 2 }
  0xbf   :  { %v180_v26 = vadd.f32 %v179_v24, %v178_v23 }
  0xc1   :  { %v181_v27 = vrot.slane %v180_v26, 1 }
  0xc3   :  { %v182_v29 = vadd.f32 %v181_v27, %v180_v26 }
  0xc5   :  { %v199_v30 = vmul.f32 %v193_v28, %v182_v29 }
  0xc7   :  { %v200_v31 = vsub.f32 %v136_v11, %v199_v30  ;;  %v201_v32 = vsub.f32 %v138_v14, %v199_v30  ;;  %v202_v33 = vsub.f32 %v141_v12, %v199_v30  ;;  %v203_v34 = vsub.f32 %v143_v15, %v199_v30 }
  0xc9   :  { %v206_v35 = vmul.f32 0.0, %v202_v33  ;;  %v207_v36 = vmul.f32 0.0, %v203_v34  ;;  %v208_v37 = vmul.f32 %v200_v31, %v200_v31  ;;  %v209_v38 = vmul.f32 %v201_v32, %v201_v32 }
  0xcb   :  { %v210_v39 = vmul.f32 %v206_v35, %v202_v33  ;;  %v212_v40 = vadd.f32 %v209_v38, %v208_v37  ;;  %v211_v41 = vmul.f32 %v207_v36, %v203_v34 }
  0xcd   :  { %v213_v42 = vadd.f32 %v212_v40, %v210_v39 }
  0xcf   :  { %v214_v43 = vadd.f32 %v213_v42, %v211_v41 }
  0xd1   :  { %v215_v44 = vrot.slane %v214_v43, 4 }
  0xd3   :  { %v216_v45 = vadd.f32 %v215_v44, %v214_v43 }
  0xd5   :  { %v217_v46 = vrot.slane %v216_v45, 2 }
  0xd7   :  { %v218_v47 = vadd.f32 %v217_v46, %v216_v45 }
  0xd9   :  { %v219_v48 = vrot.slane %v218_v47, 1 }
  0xdb   :  { %v220_v49 = vadd.f32 %v219_v48, %v218_v47 }
  0xdd   :  { %v222_v50 = vsel %vm221_vm1, %v182_v29, %v220_v49 }
  0xde   :  { %223 = vst [vmem:[#allocation8] sm:$0x3] %v222_v50 }
  0xdf   :  { %247 = dma.vmem_to_hbm [thread:$0]  %s243_s29, 32, %s245_s5, [#allocation9]  }
  0xe0   :  { %429 = dma.done.wait [#allocation4], 512  }
  0xe1   :  { %430 = vsyncadd [#allocation4], 4294966784 }
  0xe2   :  { %431 = dma.done.wait [#allocation9], 32  }
  0xe3   :  { %432 = vsyncadd [#allocation9], 4294967264 }
  0xe4   :  { %256 = vsyncpa [#allocation3], 1 }
  0xe5   :  { %257 = vsyncpa [#allocation6], 1 }
  0xe6   :  { %258 = vsyncpa [#allocation4], 1 }
  0xe7   :  { %259 = vsyncpa [#allocation9], 1 }

</bundles_post_ra>
